<compile_context>
chip_gen: v6e
topology: v6e:2x2x1
jax: 0.10.0
libtpu: 0.0.40
codegen_flags: <defaults>
</compile_context>

<pallas_src>
import math
import functools

import jax
import jax.numpy as jnp
from jax.experimental import pallas as pl
from jax.experimental.pallas import tpu as pltpu


def _round_up(x, m):
    return (x + m - 1) // m * m


def _vmem_budget_bytes():
    """~78% of this generation's physical VMEM (v7x ≈ 50 MiB, v5e/v6e ≈ 100 MiB)."""
    cap = 64 * 1024 * 1024  # v7x-safe fallback if the query is unavailable
    try:
        info = pltpu.get_tpu_info()
        cap = int(getattr(info, "vmem_capacity_bytes", cap)) or cap
    except Exception:
        pass
    return int(cap * 0.78)


def _memory_unit_kernel(x_ref, wt_ref, w_ref, out_ref, att_ref, *,
                        shrink_thres, matmul_dtype):
    # x_ref:   (tm, fea)   row tile of the input
    # wt_ref:  (fea, mem)  resident W^T  -> first dot is native (M,K)@(K,N)
    # w_ref:   (mem, fea)  resident W    -> second dot is native (M,K)@(K,N)
    # out_ref: (tm, fea)   reconstructed features
    # att_ref: (tm, mem)   attention weights
    x = x_ref[...].astype(matmul_dtype)

    # att_weight = F.linear(input, W) = x @ W^T
    att = jnp.dot(x, wt_ref[...], preferred_element_type=jnp.float32)  # (tm, mem) f32

    # F.softmax(att_weight, dim=1): reductions over the lane dimension (XLU),
    # exp + reciprocal on the EUP.
    m = jnp.max(att, axis=1, keepdims=True)
    e = jnp.exp(att - m)
    att = e * pl.reciprocal(jnp.sum(e, axis=1, keepdims=True), approx=True)

    if shrink_thres > 0:
        eps = 1e-12
        shifted = att - shrink_thres
        # hard_shrink_relu: relu(att - lambd) * att / (|att - lambd| + eps)
        # (the ratio is in [0, 1); numerator ~0 wherever the denom ~eps, so no
        #  0*inf hazard from the approximate reciprocal).
        ratio = jnp.maximum(shifted, 0.0) * pl.reciprocal(
            jnp.abs(shifted) + eps, approx=True)
        att = ratio * att
        # F.normalize(att, p=1, dim=1): att / max(||att||_1, 1e-12)
        l1 = jnp.sum(jnp.abs(att), axis=1, keepdims=True)
        att = att * pl.reciprocal(jnp.maximum(l1, 1e-12), approx=True)

    # output = F.linear(att, W^T) = att @ W
    out = jnp.dot(att.astype(matmul_dtype), w_ref[...],
                  preferred_element_type=jnp.float32)

    out_ref[...] = out.astype(out_ref.dtype)
    att_ref[...] = att.astype(att_ref.dtype)


def memory_unit_forward(x, weight, shrink_thres=0.0025, *,
                        block_rows=1024, matmul_dtype=jnp.bfloat16,
                        att_dtype=None):
    """x: (T, fea_dim), weight: (mem_dim, fea_dim). Returns dict(output, att)."""
    T, fea_dim = x.shape
    mem_dim, fea_dim_w = weight.shape
    assert fea_dim == fea_dim_w
    # att is often only consumed by a sparsity loss; pass att_dtype=jnp.bfloat16
    # to halve its (dominant, when mem_dim >> fea_dim) HBM writeback.
    att_dtype = x.dtype if att_dtype is None else att_dtype

    x_b = jnp.dtype(x.dtype).itemsize
    w_b = jnp.dtype(matmul_dtype).itemsize
    a_b = jnp.dtype(att_dtype).itemsize

    def vmem_need(tm, weight_bufs):
        stream = 2 * tm * fea_dim * x_b           # x tiles (double buffered)
        stream += 2 * tm * fea_dim * x_b          # out tiles
        stream += 2 * tm * mem_dim * a_b          # att tiles
        resident = weight_bufs * 2 * mem_dim * fea_dim * w_b   # W and W^T
        # live f32 temporaries (att / e / shifted / products, out accumulator)
        # plus the narrow-dtype matmul copies of x and att.
        interm = (4 * tm * mem_dim + 2 * tm * fea_dim) * 4
        interm += tm * (fea_dim + mem_dim) * w_b
        return stream + resident + interm

    budget = _vmem_budget_bytes()

    # Row tile: multiple of 8 sublanes, shrunk until it fits the budget.  Size
    # it assuming double-buffered weights so the Buffered(1) fallback also fits.
    tm = min(_round_up(block_rows, 8), _round_up(T, 8))
    while tm > 8 and vmem_need(tm, weight_bufs=2) > budget:
        tm = _round_up(tm // 2, 8)

    T_p = _round_up(T, tm)
    x_in = x if T_p == T else jnp.pad(x, ((0, T_p - T), (0, 0)))

    # One-time (per call) weight prep: cast to the MXU dtype and pre-build the
    # transpose so neither dot transposes the weight inside the grid body.
    w_c = weight.astype(matmul_dtype)
    wt_c = w_c.T

    kernel = functools.partial(
        _memory_unit_kernel, shrink_thres=shrink_thres, matmul_dtype=matmul_dtype)

    cost = pl.CostEstimate(
        flops=4 * T_p * fea_dim * mem_dim,                 # two matmuls
        transcendentals=3 * T_p * mem_dim,                 # exp + reciprocals
        bytes_accessed=(2 * T_p * fea_dim * x_b + T_p * mem_dim * a_b
                        + 2 * mem_dim * fea_dim * w_b))

    grid = (T_p // tm,)
    out_shape = (jax.ShapeDtypeStruct((T_p, fea_dim), x.dtype),
                 jax.ShapeDtypeStruct((T_p, mem_dim), att_dtype))

    def build_call(single_buffer_weight):
        w_kwargs = ({"pipeline_mode": pl.Buffered(1)}
                    if single_buffer_weight else {})
        return pl.pallas_call(
            kernel,
            out_shape=out_shape,
            grid=grid,
            in_specs=[
                # TODO(synk): bump to pipeline_mode=pl.Buffered(3) if profiling
                # shows exposed input DMA at small fea_dim.
                pl.BlockSpec((tm, fea_dim), lambda i: (i, 0)),          # x rows
                pl.BlockSpec((fea_dim, mem_dim), lambda i: (0, 0), **w_kwargs),
                pl.BlockSpec((mem_dim, fea_dim), lambda i: (0, 0), **w_kwargs),
            ],
            out_specs=(
                pl.BlockSpec((tm, fea_dim), lambda i: (i, 0)),
                pl.BlockSpec((tm, mem_dim), lambda i: (i, 0)),
            ),
            compiler_params=pltpu.CompilerParams(
                dimension_semantics=("parallel",),   # rows independent; v7x: 2 TCs
                vmem_limit_bytes=budget),
            cost_estimate=cost,
        )

    try:
        out, att = build_call(True)(x_in, wt_c, w_c)
    except Exception:
        # pipeline_mode=pl.Buffered(1) not supported on this JAX build: fall
        # back to the default (double-buffered) resident weight — still correct.
        out, att = build_call(False)(x_in, wt_c, w_c)

    if T_p != T:
        out = out[:T]
        att = att[:T]
    return {"output": out, "att": att}


def _reference(x, weight, shrink_thres=0.0025):
    # Pure-JAX reference mirroring the PyTorch module, for a sanity check.
    att = x @ weight.T
    att = jax.nn.softmax(att, axis=1)
    if shrink_thres > 0:
        eps = 1e-12
        shifted = att - shrink_thres
        att = jnp.maximum(shifted, 0.0) * att / (jnp.abs(shifted) + eps)
        att = att / jnp.maximum(jnp.sum(jnp.abs(att), axis=1, keepdims=True), 1e-12)
    out = att @ weight
    return out, att


if __name__ == "__main__":
    # Small shapes consistent with MemoryUnit: T rows of fea_dim features,
    # mem_dim memory slots.
    T, fea_dim, mem_dim = 8, 32, 16
    shrink_thres = 0.0025

    key = jax.random.PRNGKey(0)
    kx, kw = jax.random.split(key)

    # Deterministic init matching reset_parameters(): uniform(-stdv, stdv)
    stdv = 1.0 / math.sqrt(fea_dim)
    weight = jax.random.uniform(
        kw, (mem_dim, fea_dim), dtype=jnp.float32, minval=-stdv, maxval=stdv)
    x = jax.random.normal(kx, (T, fea_dim), dtype=jnp.float32)

    result = memory_unit_forward(x, weight, shrink_thres)
    jax.block_until_ready(result)

    ref_out, ref_att = _reference(x, weight, shrink_thres)
    # bf16 MXU operands + approx (EUP) reciprocals => ~1e-2-level deviation
    # from the exact f32 reference; loosen tolerance accordingly.
    assert jnp.allclose(result["output"], ref_out, atol=3e-2, rtol=3e-2)
    assert jnp.allclose(result["att"], ref_att, atol=3e-2, rtol=3e-2)

    print("KERNEL_OK")
</pallas_src>

<mosaic_0001>
module attributes {stable_mosaic.version = 11 : i64} {
  func.func @_memory_unit_kernel(%arg0: i32, %arg1: memref<8x32xf32, #tpu.memory_space<vmem>>, %arg2: memref<32x16xbf16, #tpu.memory_space<vmem>>, %arg3: memref<16x32xbf16, #tpu.memory_space<vmem>>, %arg4: memref<8x32xf32, #tpu.memory_space<vmem>>, %arg5: memref<8x16xf32, #tpu.memory_space<vmem>>) attributes {dimension_semantics = [#tpu.dimension_semantics<parallel>], iteration_bounds = array<i64: 1>, scalar_prefetch = 0 : i64, scratch_operands = 0 : i64, tpu.core_type = #tpu.core_type<tc>, window_params = [{transform_indices = @transform_0, window_bounds = array<i64: 8, 32>}, {pipeline_mode = #tpu.pipeline_mode<synchronous>, transform_indices = @transform_1, window_bounds = array<i64: 32, 16>}, {pipeline_mode = #tpu.pipeline_mode<synchronous>, transform_indices = @transform_2, window_bounds = array<i64: 16, 32>}, {transform_indices = @transform_3, window_bounds = array<i64: 8, 32>}, {transform_indices = @transform_4, window_bounds = array<i64: 8, 16>}]} {
    %c0 = arith.constant 0 : index
    %c0_0 = arith.constant 0 : index
    %0 = vector.load %arg1[%c0, %c0_0] : memref<8x32xf32, #tpu.memory_space<vmem>>, vector<8x32xf32>
    %1 = arith.truncf %0 : vector<8x32xf32> to vector<8x32xbf16>
    %c0_1 = arith.constant 0 : index
    %c0_2 = arith.constant 0 : index
    %2 = vector.load %arg2[%c0_1, %c0_2] : memref<32x16xbf16, #tpu.memory_space<vmem>>, vector<32x16xbf16>
    %cst = arith.constant dense<0.000000e+00> : vector<8x16xf32>
    %3 = tpu.matmul %1, %2, %cst {dimension_numbers = #tpu.dot_dimension_numbers<[1], [0], [0], [1], [0, 0, 1, 1], [], []>} : vector<8x32xbf16>, vector<32x16xbf16>, vector<8x16xf32> -> vector<8x16xf32>
    %cst_3 = arith.constant dense<0xFF800000> : vector<8xf32>
    %4 = vector.multi_reduction <maximumf>, %3, %cst_3 [1] : vector<8x16xf32> to vector<8xf32>
    %5 = vector.shape_cast %4 : vector<8xf32> to vector<8x1xf32>
    %6 = vector.broadcast %5 : vector<8x1xf32> to vector<8x16xf32>
    %7 = arith.subf %3, %6 : vector<8x16xf32>
    %8 = math.exp %7 : vector<8x16xf32>
    %cst_4 = arith.constant dense<0.000000e+00> : vector<8xf32>
    %9 = vector.multi_reduction <add>, %8, %cst_4 [1] : vector<8x16xf32> to vector<8xf32>
    %10 = vector.shape_cast %9 : vector<8xf32> to vector<8x1xf32>
    %11 = tpu.reciprocal %10 {approx = true} : vector<8x1xf32> -> vector<8x1xf32>
    %12 = vector.broadcast %11 : vector<8x1xf32> to vector<8x16xf32>
    %13 = arith.mulf %8, %12 : vector<8x16xf32>
    %cst_5 = arith.constant 2.500000e-03 : f32
    %14 = vector.broadcast %cst_5 : f32 to vector<8x16xf32>
    %15 = arith.subf %13, %14 : vector<8x16xf32>
    %cst_6 = arith.constant 0.000000e+00 : f32
    %16 = vector.broadcast %cst_6 : f32 to vector<8x16xf32>
    %17 = arith.maximumf %15, %16 : vector<8x16xf32>
    %18 = math.absf %15 : vector<8x16xf32>
    %cst_7 = arith.constant 9.99999996E-13 : f32
    %19 = vector.broadcast %cst_7 : f32 to vector<8x16xf32>
    %20 = arith.addf %18, %19 : vector<8x16xf32>
    %21 = tpu.reciprocal %20 {approx = true} : vector<8x16xf32> -> vector<8x16xf32>
    %22 = arith.mulf %17, %21 : vector<8x16xf32>
    %23 = arith.mulf %22, %13 : vector<8x16xf32>
    %24 = math.absf %23 : vector<8x16xf32>
    %cst_8 = arith.constant dense<0.000000e+00> : vector<8xf32>
    %25 = vector.multi_reduction <add>, %24, %cst_8 [1] : vector<8x16xf32> to vector<8xf32>
    %26 = vector.shape_cast %25 : vector<8xf32> to vector<8x1xf32>
    %cst_9 = arith.constant 9.99999996E-13 : f32
    %27 = vector.broadcast %cst_9 : f32 to vector<8x1xf32>
    %28 = arith.maximumf %26, %27 : vector<8x1xf32>
    %29 = tpu.reciprocal %28 {approx = true} : vector<8x1xf32> -> vector<8x1xf32>
    %30 = vector.broadcast %29 : vector<8x1xf32> to vector<8x16xf32>
    %31 = arith.mulf %23, %30 : vector<8x16xf32>
    %32 = arith.truncf %31 : vector<8x16xf32> to vector<8x16xbf16>
    %c0_10 = arith.constant 0 : index
    %c0_11 = arith.constant 0 : index
    %33 = vector.load %arg3[%c0_10, %c0_11] : memref<16x32xbf16, #tpu.memory_space<vmem>>, vector<16x32xbf16>
    %cst_12 = arith.constant dense<0.000000e+00> : vector<8x32xf32>
    %34 = tpu.matmul %32, %33, %cst_12 {dimension_numbers = #tpu.dot_dimension_numbers<[1], [0], [0], [1], [0, 0, 1, 1], [], []>} : vector<8x16xbf16>, vector<16x32xbf16>, vector<8x32xf32> -> vector<8x32xf32>
    %c0_13 = arith.constant 0 : index
    %c0_14 = arith.constant 0 : index
    %35 = vector.load %arg4[%c0_13, %c0_14] : memref<8x32xf32, #tpu.memory_space<vmem>>, vector<8x32xf32>
    tpu.vector_store %arg4[%c0_13, %c0_14], %34 {strides = array<i32>} : memref<8x32xf32, #tpu.memory_space<vmem>>, vector<8x32xf32>,
    %c0_15 = arith.constant 0 : index
    %c0_16 = arith.constant 0 : index
    %36 = vector.load %arg5[%c0_15, %c0_16] : memref<8x16xf32, #tpu.memory_space<vmem>>, vector<8x16xf32>
    tpu.vector_store %arg5[%c0_15, %c0_16], %31 {strides = array<i32>} : memref<8x16xf32, #tpu.memory_space<vmem>>, vector<8x16xf32>,
    return
  }
  func.func @transform_0(%arg0: i32) -> (i32, i32) {
    %c0_i32 = arith.constant 0 : i32
    %c0_i32_0 = arith.constant 0 : i32
    return %arg0, %c0_i32 : i32, i32
  }
  func.func @transform_1(%arg0: i32) -> (i32, i32) {
    %c0_i32 = arith.constant 0 : i32
    %c0_i32_0 = arith.constant 0 : i32
    %c0_i32_1 = arith.constant 0 : i32
    return %c0_i32, %c0_i32_0 : i32, i32
  }
  func.func @transform_2(%arg0: i32) -> (i32, i32) {
    %c0_i32 = arith.constant 0 : i32
    %c0_i32_0 = arith.constant 0 : i32
    %c0_i32_1 = arith.constant 0 : i32
    return %c0_i32, %c0_i32_0 : i32, i32
  }
  func.func @transform_3(%arg0: i32) -> (i32, i32) {
    %c0_i32 = arith.constant 0 : i32
    %c0_i32_0 = arith.constant 0 : i32
    return %arg0, %c0_i32 : i32, i32
  }
  func.func @transform_4(%arg0: i32) -> (i32, i32) {
    %c0_i32 = arith.constant 0 : i32
    %c0_i32_0 = arith.constant 0 : i32
    return %arg0, %c0_i32 : i32, i32
  }
}

module attributes {stable_mosaic.version = 11 : i64} {
  func.func @_memory_unit_kernel(%arg0: i32, %arg1: memref<8x32xf32, #tpu.memory_space<vmem>>, %arg2: memref<32x16xbf16, #tpu.memory_space<vmem>>, %arg3: memref<16x32xbf16, #tpu.memory_space<vmem>>, %arg4: memref<8x32xf32, #tpu.memory_space<vmem>>, %arg5: memref<8x16xf32, #tpu.memory_space<vmem>>) attributes {dimension_semantics = [#tpu.dimension_semantics<parallel>], iteration_bounds = array<i64: 1>, scalar_prefetch = 0 : i64, scratch_operands = 0 : i64, tpu.core_type = #tpu.core_type<tc>, window_params = [{transform_indices = @transform_0, window_bounds = array<i64: 8, 32>}, {pipeline_mode = #tpu.pipeline_mode<synchronous>, transform_indices = @transform_1, window_bounds = array<i64: 32, 16>}, {pipeline_mode = #tpu.pipeline_mode<synchronous>, transform_indices = @transform_2, window_bounds = array<i64: 16, 32>}, {transform_indices = @transform_3, window_bounds = array<i64: 8, 32>}, {transform_indices = @transform_4, window_bounds = array<i64: 8, 16>}]} {
    %c0 = arith.constant 0 : index
    %c0_0 = arith.constant 0 : index
    %0 = vector.load %arg1[%c0, %c0_0] : memref<8x32xf32, #tpu.memory_space<vmem>>, vector<8x32xf32>
    %1 = arith.truncf %0 : vector<8x32xf32> to vector<8x32xbf16>
    %c0_1 = arith.constant 0 : index
    %c0_2 = arith.constant 0 : index
    %2 = vector.load %arg2[%c0_1, %c0_2] : memref<32x16xbf16, #tpu.memory_space<vmem>>, vector<32x16xbf16>
    %cst = arith.constant dense<0.000000e+00> : vector<8x16xf32>
    %3 = tpu.matmul %1, %2, %cst {dimension_numbers = #tpu.dot_dimension_numbers<[1], [0], [0], [1], [0, 0, 1, 1], [], []>} : vector<8x32xbf16>, vector<32x16xbf16>, vector<8x16xf32> -> vector<8x16xf32>
    %cst_3 = arith.constant dense<0xFF800000> : vector<8xf32>
    %4 = vector.multi_reduction <maximumf>, %3, %cst_3 [1] : vector<8x16xf32> to vector<8xf32>
    %5 = vector.shape_cast %4 : vector<8xf32> to vector<8x1xf32>
    %6 = vector.broadcast %5 : vector<8x1xf32> to vector<8x16xf32>
    %7 = arith.subf %3, %6 : vector<8x16xf32>
    %8 = math.exp %7 : vector<8x16xf32>
    %cst_4 = arith.constant dense<0.000000e+00> : vector<8xf32>
    %9 = vector.multi_reduction <add>, %8, %cst_4 [1] : vector<8x16xf32> to vector<8xf32>
    %10 = vector.shape_cast %9 : vector<8xf32> to vector<8x1xf32>
    %11 = tpu.reciprocal %10 {approx = true} : vector<8x1xf32> -> vector<8x1xf32>
    %12 = vector.broadcast %11 : vector<8x1xf32> to vector<8x16xf32>
    %13 = arith.mulf %8, %12 : vector<8x16xf32>
    %cst_5 = arith.constant 2.500000e-03 : f32
    %14 = vector.broadcast %cst_5 : f32 to vector<8x16xf32>
    %15 = arith.subf %13, %14 : vector<8x16xf32>
    %cst_6 = arith.constant 0.000000e+00 : f32
    %16 = vector.broadcast %cst_6 : f32 to vector<8x16xf32>
    %17 = arith.maximumf %15, %16 : vector<8x16xf32>
    %18 = math.absf %15 : vector<8x16xf32>
    %cst_7 = arith.constant 9.99999996E-13 : f32
    %19 = vector.broadcast %cst_7 : f32 to vector<8x16xf32>
    %20 = arith.addf %18, %19 : vector<8x16xf32>
    %21 = tpu.reciprocal %20 {approx = true} : vector<8x16xf32> -> vector<8x16xf32>
    %22 = arith.mulf %17, %21 : vector<8x16xf32>
    %23 = arith.mulf %22, %13 : vector<8x16xf32>
    %24 = math.absf %23 : vector<8x16xf32>
    %cst_8 = arith.constant dense<0.000000e+00> : vector<8xf32>
    %25 = vector.multi_reduction <add>, %24, %cst_8 [1] : vector<8x16xf32> to vector<8xf32>
    %26 = vector.shape_cast %25 : vector<8xf32> to vector<8x1xf32>
    %cst_9 = arith.constant 9.99999996E-13 : f32
    %27 = vector.broadcast %cst_9 : f32 to vector<8x1xf32>
    %28 = arith.maximumf %26, %27 : vector<8x1xf32>
    %29 = tpu.reciprocal %28 {approx = true} : vector<8x1xf32> -> vector<8x1xf32>
    %30 = vector.broadcast %29 : vector<8x1xf32> to vector<8x16xf32>
    %31 = arith.mulf %23, %30 : vector<8x16xf32>
    %32 = arith.truncf %31 : vector<8x16xf32> to vector<8x16xbf16>
    %c0_10 = arith.constant 0 : index
    %c0_11 = arith.constant 0 : index
    %33 = vector.load %arg3[%c0_10, %c0_11] : memref<16x32xbf16, #tpu.memory_space<vmem>>, vector<16x32xbf16>
    %cst_12 = arith.constant dense<0.000000e+00> : vector<8x32xf32>
    %34 = tpu.matmul %32, %33, %cst_12 {dimension_numbers = #tpu.dot_dimension_numbers<[1], [0], [0], [1], [0, 0, 1, 1], [], []>} : vector<8x16xbf16>, vector<16x32xbf16>, vector<8x32xf32> -> vector<8x32xf32>
    %c0_13 = arith.constant 0 : index
    %c0_14 = arith.constant 0 : index
    %35 = vector.load %arg4[%c0_13, %c0_14] : memref<8x32xf32, #tpu.memory_space<vmem>>, vector<8x32xf32>
    tpu.vector_store %arg4[%c0_13, %c0_14], %34 {strides = array<i32>} : memref<8x32xf32, #tpu.memory_space<vmem>>, vector<8x32xf32>,
    %c0_15 = arith.constant 0 : index
    %c0_16 = arith.constant 0 : index
    %36 = vector.load %arg5[%c0_15, %c0_16] : memref<8x16xf32, #tpu.memory_space<vmem>>, vector<8x16xf32>
    tpu.vector_store %arg5[%c0_15, %c0_16], %31 {strides = array<i32>} : memref<8x16xf32, #tpu.memory_space<vmem>>, vector<8x16xf32>,
    return
  }
  func.func @transform_0(%arg0: i32) -> (i32, i32) {
    %c0_i32 = arith.constant 0 : i32
    %c0_i32_0 = arith.constant 0 : i32
    return %arg0, %c0_i32 : i32, i32
  }
  func.func @transform_1(%arg0: i32) -> (i32, i32) {
    %c0_i32 = arith.constant 0 : i32
    %c0_i32_0 = arith.constant 0 : i32
    %c0_i32_1 = arith.constant 0 : i32
    return %c0_i32, %c0_i32_0 : i32, i32
  }
  func.func @transform_2(%arg0: i32) -> (i32, i32) {
    %c0_i32 = arith.constant 0 : i32
    %c0_i32_0 = arith.constant 0 : i32
    %c0_i32_1 = arith.constant 0 : i32
    return %c0_i32, %c0_i32_0 : i32, i32
  }
  func.func @transform_3(%arg0: i32) -> (i32, i32) {
    %c0_i32 = arith.constant 0 : i32
    %c0_i32_0 = arith.constant 0 : i32
    return %arg0, %c0_i32 : i32, i32
  }
  func.func @transform_4(%arg0: i32) -> (i32, i32) {
    %c0_i32 = arith.constant 0 : i32
    %c0_i32_0 = arith.constant 0 : i32
    return %arg0, %c0_i32 : i32, i32
  }
}

</mosaic_0001>

<bundles_post_ra>
// kernel: tpu_custom_call.1
= control target key start
LH: loop header
LB: loop body
LE: loop exit
PB: predicated region body
PF: predicated region fallthrough
CT: control target
= control target key end

     0   :  { %10 = vsyncpa [#allocation3], 0  ;;  %v273_v1 = vmov 0.0   ;;  %vm274_vm0 = vmmov 0   ;;  %s327_s0 = inlined_call_operand.vmem [shape: f32[8,32], index: 0, kind: input, shape index: {}]   ;;  %s328_s1 = inlined_call_operand.vmem [shape: bf16[32,16], index: 1, kind: input, shape index: {}]   ;;  %s329_s2 = inlined_call_operand.vmem [shape: bf16[16,32], index: 2, kind: input, shape index: {}]   ;;  %s330_s3 = inlined_call_operand.hbm [shape: f32[8,32], index: 3, kind: output, shape index: {0}]   ;;  %s331_s4 = inlined_call_operand.hbm [shape: f32[8,16], index: 4, kind: output, shape index: {1}]  }
   0x1   :  { %v218_v0 = vld [vmem:[%s328_s1 + $0x8] sm:$0xff]   ;;  %200 = vmatprep.subr.bf16.mxu0 %v273_v1  ;;  %v219_v2 = vld [vmem:[%s328_s1] sm:$0xff]   ;;  %208 = vmatprep.subr.bf16.mxu1 %v273_v1 }
   0x2   :  { %201 = vmatpush3.bf16.msra.mxu0 %v218_v0  ;;  %204 = vmatprep.mubr.msk.bf16.mxu0 %vm274_vm0, %v273_v1  ;;  %v19_v3 = vld [vmem:[%s327_s0] sm:$0xff] }
   0x3   :  { %202 = vmatprep.subr.bf16.mxu0 %v273_v1  ;;  %210 = vmatprep.mubr.msk.bf16.mxu1 %vm274_vm0, %v273_v1 }
   0x4   :  { %11 = vsyncpa [#allocation5], 0  ;;  %v20_v4 = vpack.c.bf16 %v19_v3, %v19_v3  ;;  %vm37_vm1 = vcmask 261120   ;;  %vm81_vm2 = vcmask 130048   ;;  %v220_v27 = vld [vmem:[%s329_s2] sm:$0xff]   ;;  %s275_s21 = smov [#allocation4]  }
   0x5   :  { %209 = vmatpush3.bf16.msra.mxu1 %v220_v27  ;;  %s177_s22 = sshll.u32 %s275_s21, 4  ;;  %s178_s22 = int_to_ptr.vmem [resolvable:$true] %s177_s22 }
   0x6   :  { %203 = vmatpush3.bf16.msra.mxu0 %v219_v2  ;;  %s229_s23 = scalar_lea.vmem %s178_s22, 128  ;;  %p234_p1 = scmp.lt.s32.totalorder %s178_s22, %s178_s22 }
   0x7   :  { %p230_p0 = scmp.ne.s32.totalorder %s178_s22, %s229_s23  ;;  %p235_p2 = scmp.lt.s32.totalorder %s229_s23, %s229_s23 }
   0x9   :  { %205 = vmatmul.mubr.msk.bf16.vlgmr.msra.gmra.mxu0 %vm37_vm1, %v20_v4  ;;  %p236_p3 = por %p235_p2, %p234_p1 }
   0xb   :  { %p237_p4 = pnand %p236_p3, %p230_p0 }
  0xc9   :  { %v75_v5 = vpop.f32.mrf.mxu0 }
  0xca   :  { %v82_v6 = vsel %vm81_vm2, %v75_v5, -inf }
  0xcb   :  { %83 = vmax.xlane.f32.xlu0 %v82_v6  ;;  %v206_v7 = vpop.f32.mrf.mxu0 }
  0xcd   :  { %v78_v8 = vpop.f32.mrf.mxu0 }
  0xcf   :  { %v207_v9 = vpop.f32.mrf.mxu0 }
 0x154   :  { %v84_v10 = vpop.xlane.xlu0 %83 }
 0x155   :  { %v85_v11 = vsub.f32 %v75_v5, %v84_v10 }
 0x157   :  { %v86_v12 = vmul.f32 1.442695, %v85_v11 }
 0x159   :  { %221 = vpow2.f32 %v86_v12 }
 0x166   :  { %v222_v13 = vpop.eup %221 }
 0x167   :  { %v88_v14 = vsel %vm81_vm2, %v222_v13, 0.0 }
 0x168   :  { %89 = vadd.xlane.f32.xlu0 %v88_v14 }
 0x1f1   :  { %v90_v15 = vpop.xlane.xlu0 %89 }
 0x1f2   :  { %223 = vrcp.f32 %v90_v15 }
 0x1ff   :  { %v224_v16 = vpop.eup %223 }
 0x200   :  { %v92_v17 = vmul.f32 %v224_v16, %v222_v13 }
 0x202   :  { %v192_v18 = vadd.f32 -0.0025, %v92_v17 }
 0x204   :  { %v95_v19 = vand.u32 2147483647, %v192_v18  ;;  %v94_v21 = vmax.f32 %v192_v18, 0.0 }
 0x206   :  { %v96_v20 = vadd.f32 1e-12, %v95_v19 }
 0x208   :  { %225 = vrcp.f32 %v96_v20 }
 0x215   :  { %v226_v22 = vpop.eup %225 }
 0x216   :  { %v98_v23 = vmul.f32 %v226_v22, %v94_v21 }
 0x218   :  { %v99_v24 = vmul.f32 %v98_v23, %v92_v17 }
 0x21a   :  { %v100_v25 = vand.u32 2147483647, %v99_v24 }
 0x21c   :  { %v101_v26 = vsel %vm81_vm2, %v100_v25, 0.0 }
 0x21d   :  { %102 = vadd.xlane.f32.xlu1 %v101_v26 }
 0x2a6   :  { %v103_v28 = vpop.xlane.xlu1 %102 }
 0x2a7   :  { %v104_v29 = vmax.f32 %v103_v28, 1e-12 }
 0x2a9   :  { %227 = vrcp.f32 %v104_v29 }
 0x2b6   :  { %v228_v30 = vpop.eup %227 }
 0x2b7   :  { %v106_v31 = vmul.f32 %v228_v30, %v99_v24 }
 0x2b9   :  { %v107_v32 = vpack.c.bf16 %v106_v31, %v106_v31  ;;  %160 = vst.msk [vmem:[#allocation4] sm:$0xff] %vm81_vm2, %v106_v31 }
 0x2bb   :  { %211 = vmatmul.mubr.msk.bf16.vlgmr.msra.gmra.mxu1 %vm81_vm2, %v107_v32 }
 0x2bc   :  { %240 = shalt.err (!%p237_p4)
}
 0x2bd   :  { %180 = dma.vmem_to_hbm [thread:$0]  %s178_s22, 128, %s331_s4, [#allocation5]  }
 0x2be   :  { %s276_s25 = smov [#allocation2]  }
 0x2bf   :  { %s167_s26 = sshll.u32 %s276_s25, 4  ;;  %s168_s26 = int_to_ptr.vmem [resolvable:$true] %s167_s26 }
 0x2c0   :  { %s249_s27 = scalar_lea.vmem %s168_s26, 128  ;;  %p254_p6 = scmp.lt.s32.totalorder %s168_s26, %s168_s26 }
 0x2c1   :  { %p250_p5 = scmp.ne.s32.totalorder %s168_s26, %s249_s27  ;;  %p255_p7 = scmp.lt.s32.totalorder %s249_s27, %s249_s27 }
 0x2c3   :  { %p256_p8 = por %p255_p7, %p254_p6 }
 0x2c5   :  { %p257_p9 = pnand %p256_p8, %p250_p5 }
 0x37b   :  { %v153_v33 = vpop.f32.mrf.mxu1 }
 0x37c   :  { %159 = vst.msk [vmem:[#allocation2] sm:$0xff] %vm37_vm1, %v153_v33 }
 0x37d   :  { %v212_v34 = vpop.f32.mrf.mxu1 }
 0x37e   :  { %260 = shalt.err (!%p257_p9)
}
 0x37f   :  { %170 = dma.vmem_to_hbm [thread:$0]  %s168_s26, 128, %s330_s3, [#allocation3]   ;;  %v156_v35 = vpop.f32.mrf.mxu1 }
 0x381   :  { %v213_v36 = vpop.f32.mrf.mxu1 }
 0x382   :  { %269 = dma.done.wait [#allocation3], 128  }
 0x383   :  { %270 = vsyncadd [#allocation3], 4294967168 }
 0x384   :  { %271 = dma.done.wait [#allocation5], 128  }
 0x385   :  { %272 = vsyncadd [#allocation5], 4294967168 }
 0x386   :  { %187 = vsyncpa [#allocation3], 1 }
 0x387   :  { %188 = vsyncpa [#allocation5], 1 }

// kernel: tpu_custom_call.1
= control target key start
LH: loop header
LB: loop body
LE: loop exit
PB: predicated region body
PF: predicated region fallthrough
CT: control target
= control target key end

     0   :  { %10 = vsyncpa [#allocation3], 0  ;;  %v273_v1 = vmov 0.0   ;;  %vm274_vm0 = vmmov 0   ;;  %s327_s0 = inlined_call_operand.vmem [shape: f32[8,32], index: 0, kind: input, shape index: {}]   ;;  %s328_s1 = inlined_call_operand.vmem [shape: bf16[32,16], index: 1, kind: input, shape index: {}]   ;;  %s329_s2 = inlined_call_operand.vmem [shape: bf16[16,32], index: 2, kind: input, shape index: {}]   ;;  %s330_s3 = inlined_call_operand.hbm [shape: f32[8,32], index: 3, kind: output, shape index: {0}]   ;;  %s331_s4 = inlined_call_operand.hbm [shape: f32[8,16], index: 4, kind: output, shape index: {1}]  }
   0x1   :  { %v218_v0 = vld [vmem:[%s328_s1 + $0x8] sm:$0xff]   ;;  %200 = vmatprep.subr.bf16.mxu0 %v273_v1  ;;  %v219_v2 = vld [vmem:[%s328_s1] sm:$0xff]   ;;  %208 = vmatprep.subr.bf16.mxu1 %v273_v1 }
   0x2   :  { %201 = vmatpush3.bf16.msra.mxu0 %v218_v0  ;;  %204 = vmatprep.mubr.msk.bf16.mxu0 %vm274_vm0, %v273_v1  ;;  %v19_v3 = vld [vmem:[%s327_s0] sm:$0xff] }
   0x3   :  { %202 = vmatprep.subr.bf16.mxu0 %v273_v1  ;;  %210 = vmatprep.mubr.msk.bf16.mxu1 %vm274_vm0, %v273_v1 }
   0x4   :  { %11 = vsyncpa [#allocation5], 0  ;;  %v20_v4 = vpack.c.bf16 %v19_v3, %v19_v3  ;;  %vm37_vm1 = vcmask 261120   ;;  %vm81_vm2 = vcmask 130048   ;;  %v220_v27 = vld [vmem:[%s329_s2] sm:$0xff]   ;;  %s275_s21 = smov [#allocation4]  }
   0x5   :  { %209 = vmatpush3.bf16.msra.mxu1 %v220_v27  ;;  %s177_s22 = sshll.u32 %s275_s21, 4  ;;  %s178_s22 = int_to_ptr.vmem [resolvable:$true] %s177_s22 }
   0x6   :  { %203 = vmatpush3.bf16.msra.mxu0 %v219_v2  ;;  %s229_s23 = scalar_lea.vmem %s178_s22, 128  ;;  %p234_p1 = scmp.lt.s32.totalorder %s178_s22, %s178_s22 }
   0x7   :  { %p230_p0 = scmp.ne.s32.totalorder %s178_s22, %s229_s23  ;;  %p235_p2 = scmp.lt.s32.totalorder %s229_s23, %s229_s23 }
   0x9   :  { %205 = vmatmul.mubr.msk.bf16.vlgmr.msra.gmra.mxu0 %vm37_vm1, %v20_v4  ;;  %p236_p3 = por %p235_p2, %p234_p1 }
   0xb   :  { %p237_p4 = pnand %p236_p3, %p230_p0 }
  0xc9   :  { %v75_v5 = vpop.f32.mrf.mxu0 }
  0xca   :  { %v82_v6 = vsel %vm81_vm2, %v75_v5, -inf }
  0xcb   :  { %83 = vmax.xlane.f32.xlu0 %v82_v6  ;;  %v206_v7 = vpop.f32.mrf.mxu0 }
  0xcd   :  { %v78_v8 = vpop.f32.mrf.mxu0 }
  0xcf   :  { %v207_v9 = vpop.f32.mrf.mxu0 }
 0x154   :  { %v84_v10 = vpop.xlane.xlu0 %83 }
 0x155   :  { %v85_v11 = vsub.f32 %v75_v5, %v84_v10 }
 0x157   :  { %v86_v12 = vmul.f32 1.442695, %v85_v11 }
 0x159   :  { %221 = vpow2.f32 %v86_v12 }
 0x166   :  { %v222_v13 = vpop.eup %221 }
 0x167   :  { %v88_v14 = vsel %vm81_vm2, %v222_v13, 0.0 }
 0x168   :  { %89 = vadd.xlane.f32.xlu0 %v88_v14 }
 0x1f1   :  { %v90_v15 = vpop.xlane.xlu0 %89 }
 0x1f2   :  { %223 = vrcp.f32 %v90_v15 }
 0x1ff   :  { %v224_v16 = vpop.eup %223 }
 0x200   :  { %v92_v17 = vmul.f32 %v224_v16, %v222_v13 }
 0x202   :  { %v192_v18 = vadd.f32 -0.0025, %v92_v17 }
 0x204   :  { %v95_v19 = vand.u32 2147483647, %v192_v18  ;;  %v94_v21 = vmax.f32 %v192_v18, 0.0 }
 0x206   :  { %v96_v20 = vadd.f32 1e-12, %v95_v19 }
 0x208   :  { %225 = vrcp.f32 %v96_v20 }
 0x215   :  { %v226_v22 = vpop.eup %225 }
 0x216   :  { %v98_v23 = vmul.f32 %v226_v22, %v94_v21 }
 0x218   :  { %v99_v24 = vmul.f32 %v98_v23, %v92_v17 }
 0x21a   :  { %v100_v25 = vand.u32 2147483647, %v99_v24 }
 0x21c   :  { %v101_v26 = vsel %vm81_vm2, %v100_v25, 0.0 }
 0x21d   :  { %102 = vadd.xlane.f32.xlu1 %v101_v26 }
 0x2a6   :  { %v103_v28 = vpop.xlane.xlu1 %102 }
 0x2a7   :  { %v104_v29 = vmax.f32 %v103_v28, 1e-12 }
 0x2a9   :  { %227 = vrcp.f32 %v104_v29 }
 0x2b6   :  { %v228_v30 = vpop.eup %227 }
 0x2b7   :  { %v106_v31 = vmul.f32 %v228_v30, %v99_v24 }
 0x2b9   :  { %v107_v32 = vpack.c.bf16 %v106_v31, %v106_v31  ;;  %160 = vst.msk [vmem:[#allocation4] sm:$0xff] %vm81_vm2, %v106_v31 }
 0x2bb   :  { %211 = vmatmul.mubr.msk.bf16.vlgmr.msra.gmra.mxu1 %vm81_vm2, %v107_v32 }
 0x2bc   :  { %240 = shalt.err (!%p237_p4)
}
 0x2bd   :  { %180 = dma.vmem_to_hbm [thread:$0]  %s178_s22, 128, %s331_s4, [#allocation5]  }
 0x2be   :  { %s276_s25 = smov [#allocation2]  }
 0x2bf   :  { %s167_s26 = sshll.u32 %s276_s25, 4  ;;  %s168_s26 = int_to_ptr.vmem [resolvable:$true] %s167_s26 }
 0x2c0   :  { %s249_s27 = scalar_lea.vmem %s168_s26, 128  ;;  %p254_p6 = scmp.lt.s32.totalorder %s168_s26, %s168_s26 }
 0x2c1   :  { %p250_p5 = scmp.ne.s32.totalorder %s168_s26, %s249_s27  ;;  %p255_p7 = scmp.lt.s32.totalorder %s249_s27, %s249_s27 }
 0x2c3   :  { %p256_p8 = por %p255_p7, %p254_p6 }
 0x2c5   :  { %p257_p9 = pnand %p256_p8, %p250_p5 }
 0x37b   :  { %v153_v33 = vpop.f32.mrf.mxu1 }
 0x37c   :  { %159 = vst.msk [vmem:[#allocation2] sm:$0xff] %vm37_vm1, %v153_v33 }
 0x37d   :  { %v212_v34 = vpop.f32.mrf.mxu1 }
 0x37e   :  { %260 = shalt.err (!%p257_p9)
}
 0x37f   :  { %170 = dma.vmem_to_hbm [thread:$0]  %s168_s26, 128, %s330_s3, [#allocation3]   ;;  %v156_v35 = vpop.f32.mrf.mxu1 }
 0x381   :  { %v213_v36 = vpop.f32.mrf.mxu1 }
 0x382   :  { %269 = dma.done.wait [#allocation3], 128  }
 0x383   :  { %270 = vsyncadd [#allocation3], 4294967168 }
 0x384   :  { %271 = dma.done.wait [#allocation5], 128  }
 0x385   :  { %272 = vsyncadd [#allocation5], 4294967168 }
 0x386   :  { %187 = vsyncpa [#allocation3], 1 }
 0x387   :  { %188 = vsyncpa [#allocation5], 1 }

</bundles_post_ra>
